<compile_context>
chip_gen: v7x
topology: tpu7x:2x2x1
jax: 0.10.0
libtpu: 0.0.40
codegen_flags: <defaults>
</compile_context>

<pallas_src>
import jax
import jax.numpy as jnp
from jax.experimental import pallas as pl
from jax.experimental.pallas import tpu as pltpu


def ppo_mlp_kernel(x_ref, noise_ref, w1_ref, w2h_ref, bias_ref, out_ref):
    # w2h_ref stacks [W2 ; WH] along rows; SLAB = 2 * hidden = 128 lanes.
    slab = w2h_ref.shape[1]

    x = x_ref[...]
    b1 = bias_ref[0:1, :]
    b2 = bias_ref[1:2, :]
    bh = bias_ref[2:3, :]
    log_std = bias_ref[3:4, :]           # log_std in lanes [A:2A], 0 elsewhere (exp(0)*0 = 0)

    # layer 1: actor + critic hidden in one 128-lane matmul
    h = jnp.tanh(jnp.dot(x, w1_ref[...], preferred_element_type=jnp.float32) + b1)
    # layer 2: block-diagonal (actor || critic)
    h = jnp.tanh(jnp.dot(h, w2h_ref[0:slab, :], preferred_element_type=jnp.float32) + b2)
    # heads: mean duplicated into lanes [0:A] and [A:2A], value into lane [2A]
    head = jnp.dot(h, w2h_ref[slab:2 * slab, :], preferred_element_type=jnp.float32) + bh

    # stochastic sample only touches lanes [A:2A] (noise slab is zero elsewhere)
    out_ref[...] = (head + jnp.exp(log_std) * noise_ref[...]).astype(out_ref.dtype)


def pack_params(params, obs_dim, act_dim, hidden):
    """Pack 13 SB3 parameter arrays into 3 lane-dense slabs for the fused kernel."""
    H, A = hidden, act_dim
    slab = 2 * H
    assert slab == 128, "kernel assumes SB3 default hidden=64 (2*H = 128 lanes)"
    assert 2 * A + 1 <= slab, "act_dim too large for the 128-lane output slab"

    w1 = jnp.concatenate([params["w1p"], params["w1v"]], axis=1)          # (obs, 128)
    b1 = jnp.concatenate([params["b1p"], params["b1v"]], axis=1)          # (1, 128)

    w2 = jnp.zeros((slab, slab), jnp.float32)
    w2 = w2.at[:H, :H].set(params["w2p"]).at[H:, H:].set(params["w2v"])   # block diagonal
    b2 = jnp.concatenate([params["b2p"], params["b2v"]], axis=1)

    wh = jnp.zeros((slab, slab), jnp.float32)
    wh = wh.at[:H, 0:A].set(params["wa"])                                 # -> mean lanes
    wh = wh.at[:H, A:2 * A].set(params["wa"])                             # -> stoch lanes (mean copy)
    wh = wh.at[H:, 2 * A:2 * A + 1].set(params["wv"])                     # -> value lane
    bh = jnp.zeros((1, slab), jnp.float32)
    bh = bh.at[:, 0:A].set(params["ba"]).at[:, A:2 * A].set(params["ba"])
    bh = bh.at[:, 2 * A:2 * A + 1].set(params["bv"])

    ls = jnp.zeros((1, slab), jnp.float32).at[:, A:2 * A].set(params["log_std"])

    w2h = jnp.concatenate([w2, wh], axis=0)                               # (256, 128)
    bias_pack = jnp.concatenate([b1, b2, bh, ls], axis=0)                 # (4, 128)
    return w1, w2h, bias_pack


def ppo_policy_forward(state, noise, params, *, tb=128):
    """Fused actor-critic forward. Returns (mean_action, stochastic_action, value)."""
    B, obs_dim = state.shape
    A = params["wa"].shape[1]
    H = params["w1p"].shape[1]
    slab = 2 * H

    w1, w2h, bias_pack = pack_params(params, obs_dim, A, H)

    # Pad batch to a multiple of the batch tile.
    Bp = pl.cdiv(B, tb) * tb
    if Bp != B:
        state = jnp.pad(state, ((0, Bp - B), (0, 0)))
        noise = jnp.pad(noise, ((0, Bp - B), (0, 0)))

    # Noise pre-placed into the stochastic lanes of the output slab (zeros elsewhere).
    noise_slab = jnp.zeros((Bp, slab), jnp.float32).at[:, A:2 * A].set(noise)

    def batch_map(i):
        return (i, 0)

    def const_map(i):
        return (0, 0)

    out = pl.pallas_call(
        ppo_mlp_kernel,
        out_shape=jax.ShapeDtypeStruct((Bp, slab), jnp.float32),
        grid=(Bp // tb,),
        in_specs=[
            pl.BlockSpec((tb, obs_dim), batch_map),      # state tile (pipelined over batch)
            pl.BlockSpec((tb, slab), batch_map),         # noise slab tile
            pl.BlockSpec((obs_dim, slab), const_map),    # W1   (VMEM-resident)
            pl.BlockSpec((2 * slab, slab), const_map),   # [W2 ; WH] (VMEM-resident)
            pl.BlockSpec((4, slab), const_map),          # biases + log_std (VMEM-resident)
        ],
        out_specs=pl.BlockSpec((tb, slab), batch_map),   # lane-dense output slab
        compiler_params=pltpu.CompilerParams(
            dimension_semantics=("parallel",)),          # megacore-shardable batch axis
    )(state, noise_slab, w1, w2h, bias_pack)

    mean = out[:B, 0:A]
    stoch = out[:B, A:2 * A]
    value = out[:B, 2 * A:2 * A + 1]
    return mean, stoch, value


def make_params(key, obs_dim, act_dim, hidden):
    """Deterministic synthetic parameters (shapes match SB3 MlpPolicy defaults: 2x64 tanh)."""
    ks = jax.random.split(key, 10)

    def lin(k, fan_in, fan_out):
        lim = 1.0 / jnp.sqrt(jnp.float32(fan_in))
        w = jax.random.uniform(k, (fan_in, fan_out), jnp.float32, -lim, lim)
        b = jnp.zeros((1, fan_out), jnp.float32)
        return w, b

    w1p, b1p = lin(ks[0], obs_dim, hidden)
    w2p, b2p = lin(ks[1], hidden, hidden)
    wa, ba = lin(ks[2], hidden, act_dim)
    w1v, b1v = lin(ks[3], obs_dim, hidden)
    w2v, b2v = lin(ks[4], hidden, hidden)
    wv, bv = lin(ks[5], hidden, 1)
    log_std = jnp.zeros((1, act_dim), jnp.float32)   # SB3 PPO init: log_std = 0

    return dict(w1p=w1p, b1p=b1p, w2p=w2p, b2p=b2p, wa=wa, ba=ba, log_std=log_std,
                w1v=w1v, b1v=b1v, w2v=w2v, b2v=b2v, wv=wv, bv=bv)


if __name__ == "__main__":
    # MuJoCo-like shapes: obs_dim=16, act_dim=8, hidden=64; batch of 256 rollout states
    # tiled over the grid as 2 x 128-row batch tiles.
    B, OBS, ACT, HID = 256, 16, 8, 64

    key = jax.random.PRNGKey(0)
    k_state, k_noise, k_params = jax.random.split(key, 3)

    state = jax.random.normal(k_state, (B, OBS), jnp.float32)
    noise = jax.random.normal(k_noise, (B, ACT), jnp.float32)  # eps for the stochastic sample
    params = make_params(k_params, OBS, ACT, HID)

    mean_act, stoch_act, value = ppo_policy_forward(state, noise, params, tb=128)
    jax.block_until_ready((mean_act, stoch_act, value))

    # reference check in plain JAX (original, un-fused parameterization)
    def ref(x):
        h = jnp.tanh(x @ params["w1p"] + params["b1p"])
        h = jnp.tanh(h @ params["w2p"] + params["b2p"])
        m = h @ params["wa"] + params["ba"]
        s = m + jnp.exp(params["log_std"]) * noise
        hv = jnp.tanh(x @ params["w1v"] + params["b1v"])
        hv = jnp.tanh(hv @ params["w2v"] + params["b2v"])
        v = hv @ params["wv"] + params["bv"]
        return m, s, v

    rm, rs, rv = ref(state)
    assert jnp.allclose(mean_act, rm, atol=1e-4), float(jnp.max(jnp.abs(mean_act - rm)))
    assert jnp.allclose(stoch_act, rs, atol=1e-4), float(jnp.max(jnp.abs(stoch_act - rs)))
    assert jnp.allclose(value, rv, atol=1e-4), float(jnp.max(jnp.abs(value - rv)))

    # TODO(synk): the original forward()/log_prob() raise Exception in PyTorch; only the
    # sample()/predict compute path (actor mean, Gaussian sample, critic value) is implemented.
    print("KERNEL_OK")
</pallas_src>

<mosaic_0001>
module attributes {stable_mosaic.version = 11 : i64} {
  func.func @ppo_mlp_kernel(%arg0: i32, %arg1: memref<128x16xf32, #tpu.memory_space<vmem>>, %arg2: memref<128x128xf32, #tpu.memory_space<vmem>>, %arg3: memref<16x128xf32, #tpu.memory_space<vmem>>, %arg4: memref<256x128xf32, #tpu.memory_space<vmem>>, %arg5: memref<4x128xf32, #tpu.memory_space<vmem>>, %arg6: memref<128x128xf32, #tpu.memory_space<vmem>>) attributes {dimension_semantics = [#tpu.dimension_semantics<parallel>], iteration_bounds = array<i64: 2>, scalar_prefetch = 0 : i64, scratch_operands = 0 : i64, tpu.core_type = #tpu.core_type<tc>, window_params = [{transform_indices = @transform_0, window_bounds = array<i64: 128, 16>}, {transform_indices = @transform_1, window_bounds = array<i64: 128, 128>}, {pipeline_mode = #tpu.pipeline_mode<synchronous>, transform_indices = @transform_2, window_bounds = array<i64: 16, 128>}, {pipeline_mode = #tpu.pipeline_mode<synchronous>, transform_indices = @transform_3, window_bounds = array<i64: 256, 128>}, {pipeline_mode = #tpu.pipeline_mode<synchronous>, transform_indices = @transform_4, window_bounds = array<i64: 4, 128>}, {transform_indices = @transform_5, window_bounds = array<i64: 128, 128>}]} {
    %c0 = arith.constant 0 : index
    %c0_0 = arith.constant 0 : index
    %0 = vector.load %arg1[%c0, %c0_0] : memref<128x16xf32, #tpu.memory_space<vmem>>, vector<128x16xf32>
    %c0_1 = arith.constant 0 : index
    %c0_2 = arith.constant 0 : index
    %1 = vector.load %arg5[%c0_1, %c0_2] : memref<4x128xf32, #tpu.memory_space<vmem>>, vector<1x128xf32>
    %c1 = arith.constant 1 : index
    %c0_3 = arith.constant 0 : index
    %2 = vector.load %arg5[%c1, %c0_3] : memref<4x128xf32, #tpu.memory_space<vmem>>, vector<1x128xf32>
    %c2 = arith.constant 2 : index
    %c0_4 = arith.constant 0 : index
    %3 = vector.load %arg5[%c2, %c0_4] : memref<4x128xf32, #tpu.memory_space<vmem>>, vector<1x128xf32>
    %c3 = arith.constant 3 : index
    %c0_5 = arith.constant 0 : index
    %4 = vector.load %arg5[%c3, %c0_5] : memref<4x128xf32, #tpu.memory_space<vmem>>, vector<1x128xf32>
    %c0_6 = arith.constant 0 : index
    %c0_7 = arith.constant 0 : index
    %5 = vector.load %arg3[%c0_6, %c0_7] : memref<16x128xf32, #tpu.memory_space<vmem>>, vector<16x128xf32>
    %cst = arith.constant dense<0.000000e+00> : vector<128x128xf32>
    %6 = tpu.matmul %0, %5, %cst {dimension_numbers = #tpu.dot_dimension_numbers<[1], [0], [0], [1], [0, 0, 1, 1], [], []>} : vector<128x16xf32>, vector<16x128xf32>, vector<128x128xf32> -> vector<128x128xf32>
    %7 = vector.broadcast %1 : vector<1x128xf32> to vector<128x128xf32>
    %8 = arith.addf %6, %7 : vector<128x128xf32>
    %9 = math.tanh %8 : vector<128x128xf32>
    %c0_8 = arith.constant 0 : index
    %c0_9 = arith.constant 0 : index
    %10 = vector.load %arg4[%c0_8, %c0_9] : memref<256x128xf32, #tpu.memory_space<vmem>>, vector<128x128xf32>
    %cst_10 = arith.constant dense<0.000000e+00> : vector<128x128xf32>
    %11 = tpu.matmul %9, %10, %cst_10 {dimension_numbers = #tpu.dot_dimension_numbers<[1], [0], [0], [1], [0, 0, 1, 1], [], []>} : vector<128x128xf32>, vector<128x128xf32>, vector<128x128xf32> -> vector<128x128xf32>
    %12 = vector.broadcast %2 : vector<1x128xf32> to vector<128x128xf32>
    %13 = arith.addf %11, %12 : vector<128x128xf32>
    %14 = math.tanh %13 : vector<128x128xf32>
    %c128 = arith.constant 128 : index
    %c0_11 = arith.constant 0 : index
    %15 = vector.load %arg4[%c128, %c0_11] : memref<256x128xf32, #tpu.memory_space<vmem>>, vector<128x128xf32>
    %cst_12 = arith.constant dense<0.000000e+00> : vector<128x128xf32>
    %16 = tpu.matmul %14, %15, %cst_12 {dimension_numbers = #tpu.dot_dimension_numbers<[1], [0], [0], [1], [0, 0, 1, 1], [], []>} : vector<128x128xf32>, vector<128x128xf32>, vector<128x128xf32> -> vector<128x128xf32>
    %17 = vector.broadcast %3 : vector<1x128xf32> to vector<128x128xf32>
    %18 = arith.addf %16, %17 : vector<128x128xf32>
    %19 = math.exp %4 : vector<1x128xf32>
    %c0_13 = arith.constant 0 : index
    %c0_14 = arith.constant 0 : index
    %20 = vector.load %arg2[%c0_13, %c0_14] : memref<128x128xf32, #tpu.memory_space<vmem>>, vector<128x128xf32>
    %21 = vector.broadcast %19 : vector<1x128xf32> to vector<128x128xf32>
    %22 = arith.mulf %21, %20 : vector<128x128xf32>
    %23 = arith.addf %18, %22 : vector<128x128xf32>
    %c0_15 = arith.constant 0 : index
    %c0_16 = arith.constant 0 : index
    %24 = vector.load %arg6[%c0_15, %c0_16] : memref<128x128xf32, #tpu.memory_space<vmem>>, vector<128x128xf32>
    tpu.vector_store %arg6[%c0_15, %c0_16], %23 {strides = array<i32>} : memref<128x128xf32, #tpu.memory_space<vmem>>, vector<128x128xf32>,
    return
  }
  func.func @transform_0(%arg0: i32) -> (i32, i32) {
    %c0_i32 = arith.constant 0 : i32
    %c0_i32_0 = arith.constant 0 : i32
    return %arg0, %c0_i32 : i32, i32
  }
  func.func @transform_1(%arg0: i32) -> (i32, i32) {
    %c0_i32 = arith.constant 0 : i32
    %c0_i32_0 = arith.constant 0 : i32
    return %arg0, %c0_i32 : i32, i32
  }
  func.func @transform_2(%arg0: i32) -> (i32, i32) {
    %c0_i32 = arith.constant 0 : i32
    %c0_i32_0 = arith.constant 0 : i32
    %c0_i32_1 = arith.constant 0 : i32
    return %c0_i32, %c0_i32_0 : i32, i32
  }
  func.func @transform_3(%arg0: i32) -> (i32, i32) {
    %c0_i32 = arith.constant 0 : i32
    %c0_i32_0 = arith.constant 0 : i32
    %c0_i32_1 = arith.constant 0 : i32
    return %c0_i32, %c0_i32_0 : i32, i32
  }
  func.func @transform_4(%arg0: i32) -> (i32, i32) {
    %c0_i32 = arith.constant 0 : i32
    %c0_i32_0 = arith.constant 0 : i32
    %c0_i32_1 = arith.constant 0 : i32
    return %c0_i32, %c0_i32_0 : i32, i32
  }
  func.func @transform_5(%arg0: i32) -> (i32, i32) {
    %c0_i32 = arith.constant 0 : i32
    %c0_i32_0 = arith.constant 0 : i32
    return %arg0, %c0_i32 : i32, i32
  }
}

</mosaic_0001>

<bundles_post_ra>
// kernel: tpu_custom_call.1
= control target key start
LH: loop header
LB: loop body
LE: loop exit
PB: predicated region body
PF: predicated region fallthrough
CT: control target
= control target key end

     0   :  { %10 = vsyncpa [#allocation3], 0  ;;  %s1905_s0 = inlined_call_operand.vmem [shape: f32[256,16], index: 0, kind: input, shape index: {}]   ;;  %s1906_s1 = inlined_call_operand.vmem [shape: f32[256,128], index: 1, kind: input, shape index: {}]   ;;  %s1907_s2 = inlined_call_operand.vmem [shape: f32[16,128], index: 2, kind: input, shape index: {}]   ;;  %s1908_s3 = inlined_call_operand.hbm [shape: f32[256,128], index: 3, kind: input, shape index: {}]   ;;  %s1909_s4 = inlined_call_operand.vmem [shape: f32[4,128], index: 4, kind: input, shape index: {}]   ;;  %s1910_s5 = inlined_call_operand.hbm [shape: f32[256,128], index: 5, kind: output, shape index: {}]  }
   0x1   :  { %11 = vsyncpa [#allocation4], 0 }
   0x2   :  { %13 = vsyncpa [#allocation4 + $0x1], 0  ;;  %s1593_s18 = smov 0   ;;  %s1595_s19 = smov 0  }
   0x3   :  { %s1597_s20 = smov 0   ;;  %s1599_s21 = smov 0  }
   0x4 LB: > { %s1614_s22 = sadd.s32 4294967295, %s1555_s21   ;;  %s1015_s23 = sadd.s32 4294967294, %s1555_s21   ;;  %s1555_s21 = sphi %s1599_s21, %s1926_s21   ;;  %s1551_s20 = sphi %s1597_s20, %s1925_s20   ;;  %s1547_s19 = sphi %s1595_s19, %s1924_s19   ;;  %s1543_s18 = sphi %s1593_s18, %s1923_s18  }
   0x5   : > { %s1618_s24 = sadd.s32 1, %s1555_s21   ;;  %s141_s25 = sadd.s32 1, %s1551_s20 }
   0x6   : > { %s138_s26 = ssub.s32 %s1555_s21, %s1618_s24  ;;  %p151_p0 = scmp.ne.s32.totalorder %s1551_s20, %s1547_s19 }
   0x7   : > { %p139_p1 = scmp.eq.s32.totalorder %s138_s26, 0  ;;  %p152_p2 = scmp.eq.s32.totalorder %s1614_s22, 1 }
   0x8   : > { %p157_p3 = scmp.ne.s32.totalorder %s1547_s19, %s1543_s18  ;;  %p158_p4 = scmp.eq.s32.totalorder %s1015_s23, 1 }
   0x9   : > { %s1629_s27 = scalar_select %p139_p1, %s1551_s20, %s141_s25  }
   0xa   : > { %p1631_p5 = por %p152_p2, %p151_p0  ;;  %p1635_p6 = por %p158_p4, %p157_p3 }
   0xb   : > { %p1016_p7 = scmp.ge.s32.totalorder %s1555_s21, 1  ;;  %p165_p8 = scmp.lt.s32.totalorder %s1555_s21, 3 }
   0xc   : > { %s1914_s28 = scalar_select %p1631_p5, 1, 0 }
   0xd   : > { %s1915_s29 = scalar_select %p1635_p6, 1, 0 }
   0xe   : > { %p1911_p9 = scmp.eq.s32.totalorder %s1614_s22, 0  ;;  %p1642_p10 = pnand %p1016_p7, %p165_p8 }
   0xf   : > { %s1557_s6 = smov [#allocation2]   ;;  %s1461_s11 = scalar_lea.hbm %s1908_s3, 4096 }
  0x10   : > { %s1916_s30 = scalar_select %p1642_p10, 1, 0 }
  0x11   : > { %s180_s7 = sshll.u32 %s1557_s6, 4  ;;  %p1347_p11 = pneg %p1642_p10  ;;  %s181_s7 = int_to_ptr.vmem [resolvable:$true] %s180_s7 }
  0x12   : > { %p1462_p13 = scmp.ne.s32.totalorder %s1908_s3, %s1461_s11  ;;  %p1468_p3 = scmp.lt.u32.totalorder %s1461_s11, %s1908_s3 }
  0x13   : > { %p1650_p12 = pnand %p1911_p9, %p1347_p11 }
  0x15   : > { %p1463_p0 = pneg %p1650_p12 }
  0x17   : > { %p1464_p1 = pnand %p1463_p0, %p1462_p13 }
  0x19   : > { %p1465_p2 = pneg %p1464_p1 }
  0x1b   : > { %p1470_p4 = pnand %p1468_p3, %p1465_p2 }
  0x1d   : > { %1473 = shalt.err (!%p1470_p4)
}
  0x1e   : > { %s1474_s16 = scalar_lea.vmem %s181_s7, 4096  ;;  %p1482_p9 = scmp.lt.s32.totalorder %s181_s7, %s181_s7 }
  0x1f   : > { %p1475_p7 = scmp.ne.s32.totalorder %s181_s7, %s1474_s16  ;;  %p1483_p6 = scmp.lt.s32.totalorder %s1474_s16, %s1474_s16 }
  0x21   : > { %p1477_p8 = pnand %p1475_p7, %p1463_p0  ;;  %p1484_p5 = por %p1483_p6, %p1482_p9 }
  0x23   : > { %p1478_p11 = pneg %p1477_p8 }
  0x25   : > { %p1485_p10 = pnand %p1484_p5, %p1478_p11 }
  0x27   : > { %1488 = shalt.err (!%p1485_p10)
}
  0x28   : > { %s1558_s17 = smov 128   ;;  %s1559_s23 = smov 8  }
  0x29   : > { %1350 = dma.hbm_to_vmem [thread:$0]  (!%p1650_p12), %s1908_s3, 4096, %s181_s7, [#allocation3], %s1558_s17, %s1558_s17, %s1559_s23  }
  0x2a   : > { %p1918_p13 = scmp.ne.s32.totalorder %s1916_s30, 0 }
  0x2b   : > { %p1919_p1 = scmp.eq.s32.totalorder (!%p1918_p13), %s1614_s22, 0 }
  0x2c   : > { %217 = sbr.rel (%p1918_p13) target bundleno = 774 (0x306), region = 40 }
  0x33   : > { %1534 = dma.done.wait (%p1919_p1), [#allocation3], 4096   ;;  %p1920_p0 = pmov %p1919_p1 }
  0x34   : > { %s1022_s6 = sshll.u32 %s1614_s22, 4  ;;  %vm289_vm0 = vcmask 130048   ;;  %v283_v0 = vld [vmem:[%s1907_s2] sm:$0xff]  ;;  %v284_v1 = vld [vmem:[%s1907_s2 + $0x8] sm:$0xff]  ;;  %v501_v8 = vld [vmem:[#allocation2 + $0x10] sm:$0xff]  ;;  %s1050_s12 = sshll.u32 %s1614_s22, 11 }
  0x35   : > { %1536 = vsyncadd (%p1920_p0), [#allocation3], 4294963200  ;;  %p251_p5 = scmp.lt.s32.totalorder %s1022_s6, 31  ;;  %v1273_v3 = vpack.c.bf16 %v284_v1, %v283_v0  ;;  %v499_v6 = vld [vmem:[#allocation2] sm:$0xff]  ;;  %v500_v7 = vld [vmem:[#allocation2 + $0x8] sm:$0xff]  ;;  %s1856_s16 = scalar_lea.hbm %s1910_s5, %s1050_s12 }
  0x36   : > { %v1277_v9 = vpack.c.bf16 %v500_v7, %v499_v6  ;;  %v502_v10 = vld [vmem:[#allocation2 + $0x18] sm:$0xff]  ;;  %v503_v13 = vld [vmem:[#allocation2 + $0x20] sm:$0xff]  ;;  %v504_v14 = vld [vmem:[#allocation2 + $0x28] sm:$0xff]  ;;  %p1921_p9 = scmp.ne.s32.totalorder %s1914_s28, 0  ;;  %s1560_s23 = smov [#allocation5]  }
  0x37   : > { %s1928_s6 = smov (!%p251_p5, %s1022_s6), 31  ;;  %1274 = vmatprep.subr.bf16.mxu0 %v1273_v3  ;;  %v1281_v12 = vpack.c.bf16 %v502_v10, %v501_v8  ;;  %v1285_v16 = vpack.c.bf16 %v504_v14, %v503_v13  ;;  %v505_v18 = vld [vmem:[#allocation2 + $0x30] sm:$0xff]  ;;  %v506_v19 = vld [vmem:[#allocation2 + $0x38] sm:$0xff]  ;;  %v507_v31 = vld [vmem:[#allocation2 + $0x40] sm:$0xff]  ;;  %s1493_s25 = sshll.u32 %s1560_s23, 4  ;;  %s1494_s25 = int_to_ptr.vmem [resolvable:$false] %s1493_s25 }
  0x38   : > { %s1023_s8 = sshll.u32 %s1928_s6, 3  ;;  %1276 = vmatpush3.bf16.msra.mxu0 %v1273_v3  ;;  %1278 = vmatprep.subr.bf16.mxu1 %v1277_v9  ;;  %v1289_v21 = vpack.c.bf16 %v506_v19, %v505_v18  ;;  %v508_v32 = vld [vmem:[#allocation2 + $0x48] sm:$0xff]  ;;  %v509_v34 = vld [vmem:[#allocation2 + $0x50] sm:$0xff]  ;;  %v510_v35 = vld [vmem:[#allocation2 + $0x58] sm:$0xff]  ;;  %s1495_s26 = scalar_lea.vmem %s1494_s25, 4096 }
  0x39   : > { %s1685_s30 = scalar_lea.vmem %s1905_s0, %s1023_s8  ;;  %1280 = vmatpush3.bf16.msra.mxu1 %v1277_v9  ;;  %v1293_v33 = vpack.c.bf16 %v508_v32, %v507_v31  ;;  %v1297_v36 = vpack.c.bf16 %v510_v35, %v509_v34  ;;  %v511_v37 = vld [vmem:[#allocation2 + $0x60] sm:$0xff]  ;;  %v512_v38 = vld [vmem:[#allocation2 + $0x68] sm:$0xff]  ;;  %v513_v40 = vld [vmem:[#allocation2 + $0x70] sm:$0xff]  ;;  %s1775_s9 = scalar_lea.vmem %s1906_s1, %s1023_s8 }
  0x3a   : > { %v263_v2 = vld [vmem:[%s1685_s30] sm:$0xff]  ;;  %v264_v4 = vld [vmem:[%s1685_s30 + $0x8] sm:$0xff]  ;;  %v265_v5 = vld [vmem:[%s1685_s30 + $0x10] sm:$0xff]  ;;  %1282 = vmatprep.subr.bf16.mxu1 %v1281_v12  ;;  %v1301_v39 = vpack.c.bf16 %v512_v38, %v511_v37 }
  0x3b   : > { %1137 = vmatprep.mubr.msk.f32.mxu0 %vm289_vm0, %v263_v2  ;;  %v266_v11 = vld [vmem:[%s1685_s30 + $0x18] sm:$0xff]  ;;  %v267_v15 = vld [vmem:[%s1685_s30 + $0x20] sm:$0xff]  ;;  %v268_v17 = vld [vmem:[%s1685_s30 + $0x28] sm:$0xff] }
  0x3c   : > { %1138 = vmatmul.mubr.msk.f32.vlgmr.msra.gmra.mrb[0].mxu0 %vm289_vm0, %v264_v4  ;;  %v269_v20 = vld [vmem:[%s1685_s30 + $0x30] sm:$0xff]  ;;  %v270_v22 = vld [vmem:[%s1685_s30 + $0x38] sm:$0xff]  ;;  %v271_v23 = vld [vmem:[%s1685_s30 + $0x40] sm:$0xff] }
  0x3d   : > { %1140 = vmatprep.mubr.msk.f32.mxu0 %vm289_vm0, %v265_v5  ;;  %1284 = vmatpush3.bf16.msra.mxu1 %v1281_v12  ;;  %v272_v24 = vld [vmem:[%s1685_s30 + $0x48] sm:$0xff]  ;;  %v273_v25 = vld [vmem:[%s1685_s30 + $0x50] sm:$0xff]  ;;  %v274_v26 = vld [vmem:[%s1685_s30 + $0x58] sm:$0xff] }
  0x3e   : > { %1286 = vmatprep.subr.bf16.mxu1 %v1285_v16  ;;  %v275_v27 = vld [vmem:[%s1685_s30 + $0x60] sm:$0xff]  ;;  %v276_v28 = vld [vmem:[%s1685_s30 + $0x68] sm:$0xff]  ;;  %v277_v29 = vld [vmem:[%s1685_s30 + $0x70] sm:$0xff] }
  0x3f   : > { %v278_v30 = vld [vmem:[%s1685_s30 + $0x78] sm:$0xff]  ;;  %v680_v43 = vld [vmem:[#allocation2 + $0x80] sm:$0xff]  ;;  %v681_v44 = vld [vmem:[#allocation2 + $0x88] sm:$0xff]  ;;  %s247_s30 = sand.u32 1, %s1547_s19  }
  0x40   : > { %1141 = vmatmul.mubr.msk.f32.gmra.mrb[2].mxu0 %vm289_vm0, %v266_v11  ;;  %v514_v41 = vld [vmem:[#allocation2 + $0x78] sm:$0xff]  ;;  %v682_v45 = vld [vmem:[#allocation2 + $0x90] sm:$0xff]  ;;  %v1309_v46 = vpack.c.bf16 %v681_v44, %v680_v43  ;;  %v684_v49 = vld [vmem:[#allocation2 + $0xa0] sm:$0xff]  ;;  %s1021_s6 = sshll.u32 %s247_s30, 7  ;;  %s1864_s22 = scalar_lea.sflag [#allocation4], %s247_s30 }
  0x41   : > { %1143 = vmatprep.mubr.msk.f32.mxu0 %vm289_vm0, %v267_v15  ;;  %1288 = vmatpush3.bf16.msra.mxu1 %v1285_v16  ;;  %v1305_v42 = vpack.c.bf16 %v514_v41, %v513_v40  ;;  %v683_v47 = vld [vmem:[#allocation2 + $0x98] sm:$0xff]  ;;  %v685_v50 = vld [vmem:[#allocation2 + $0xa8] sm:$0xff]  ;;  %v686_v52 = vld [vmem:[#allocation2 + $0xb0] sm:$0xff]  ;;  %s1798_s8 = scalar_lea.vmem [#allocation5], %s1021_s6 }
  0x42   : > { %1290 = vmatprep.subr.bf16.mxu1 %v1289_v21  ;;  %v1313_v48 = vpack.c.bf16 %v683_v47, %v682_v45  ;;  %1310 = vmatprep.subr.bf16.mxu0 %v1309_v46  ;;  %v1317_v51 = vpack.c.bf16 %v685_v50, %v684_v49  ;;  %v687_v53 = vld [vmem:[#allocation2 + $0xb8] sm:$0xff]  ;;  %v688_v55 = vld [vmem:[#allocation2 + $0xc0] sm:$0xff]  ;;  %v689_v56 = vld [vmem:[#allocation2 + $0xc8] sm:$0xff]  ;;  %s929_s13 = sshll.u32 %s1798_s8, 4  ;;  %s1858_s13 = int_to_ptr.vmem [resolvable:$true] %s929_s13 }
  0x43   : > { %1312 = vmatpush3.bf16.msra.mxu0 %v1309_v46  ;;  %v1321_v54 = vpack.c.bf16 %v687_v53, %v686_v52  ;;  %v1325_v57 = vpack.c.bf16 %v689_v56, %v688_v55  ;;  %v1728_v58 = vld [vmem:[%s1909_s4] ss:$0 sm:$0xff]  ;;  %v690_v43 = vld [vmem:[#allocation2 + $0xd0] sm:$0xff]  ;;  %v691_v44 = vld [vmem:[#allocation2 + $0xd8] sm:$0xff]  ;;  %s1489_s17 = scalar_lea.vmem %s1858_s13, 2048  ;;  %p1496_p2 = scmp.lt.s32.totalorder %s1858_s13, %s1494_s25 }
  0x44   : > { %1144 = vmatmul.mubr.msk.f32.gmra.mrb[4].mxu0 %vm289_vm0, %v268_v17  ;;  %1314 = vmatprep.subr.bf16.mxu0 %v1313_v48  ;;  %v1329_v45 = vpack.c.bf16 %v691_v44, %v690_v43  ;;  %v692_v46 = vld [vmem:[#allocation2 + $0xe0] sm:$0xff]  ;;  %v693_v47 = vld [vmem:[#allocation2 + $0xe8] sm:$0xff]  ;;  %v694_v49 = vld [vmem:[#allocation2 + $0xf0] sm:$0xff]  ;;  %p1490_p6 = scmp.ne.s32.totalorder %s1858_s13, %s1489_s17  ;;  %p1497_p3 = scmp.lt.s32.totalorder %s1495_s26, %s1489_s17 }
  0x45   : > { %1146 = vmatprep.mubr.msk.f32.mxu0 %vm289_vm0, %v269_v20  ;;  %1292 = vmatpush3.bf16.msra.mxu1 %v1289_v21  ;;  %v695_v50 = vld [vmem:[#allocation2 + $0xf8] sm:$0xff]  ;;  %v1749_v52 = vld [vmem:[%s1909_s4 + $0x1] ss:$0 sm:$0xff]  ;;  %v848_v44 = vld [vmem:[%s1775_s9 + $0x8] sm:$0xff] }
  0x46   : > { %1294 = vmatprep.subr.bf16.mxu1 %v1293_v33  ;;  %p1491_p10 = pnand %p1490_p6, %p1921_p9  ;;  %p1498_p4 = por %p1497_p3, %p1496_p2 }
  0x47   : > { %1316 = vmatpush3.bf16.msra.mxu0 %v1313_v48  ;;  %v1333_v48 = vpack.c.bf16 %v693_v47, %v692_v46  ;;  %v1785_v46 = vld [vmem:[%s1909_s4 + $0x2] ss:$0 sm:$0xff] }
  0x48   : > { %1147 = vmatmul.mubr.msk.f32.gmra.mrb[6].mxu0 %vm289_vm0, %v270_v22  ;;  %1318 = vmatprep.subr.bf16.mxu0 %v1317_v51  ;;  %p1492_p12 = pneg %p1491_p10 }
  0x49   : > { %1149 = vmatprep.mubr.msk.f32.mxu0 %vm289_vm0, %v271_v23  ;;  %1296 = vmatpush3.bf16.msra.mxu1 %v1293_v33 }
  0x4a   : > { %1298 = vmatprep.subr.bf16.mxu1 %v1297_v36  ;;  %p1499_p7 = pnand %p1498_p4, %p1492_p12 }
  0x4b   : > { %1320 = vmatpush3.bf16.msra.mxu0 %v1317_v51  ;;  %v1337_v51 = vpack.c.bf16 %v695_v50, %v694_v49  ;;  %v850_v50 = vld [vmem:[%s1775_s9 + $0x18] sm:$0xff] }
  0x4c   : > { %1150 = vmatmul.mubr.msk.f32.gmra.mrb[8].mxu0 %vm289_vm0, %v272_v24  ;;  %1322 = vmatprep.subr.bf16.mxu0 %v1321_v54 }
  0x4d   : > { %1152 = vmatprep.mubr.msk.f32.mxu0 %vm289_vm0, %v273_v25  ;;  %1300 = vmatpush3.bf16.msra.mxu1 %v1297_v36 }
  0x4e   : > { %1302 = vmatprep.subr.bf16.mxu1 %v1301_v39 }
  0x4f   : > { %1324 = vmatpush3.bf16.msra.mxu0 %v1321_v54 }
  0x50   : > { %1153 = vmatmul.mubr.msk.f32.gmra.mrb[10].mxu0 %vm289_vm0, %v274_v26  ;;  %1326 = vmatprep.subr.bf16.mxu0 %v1325_v57 }
  0x51   : > { %1155 = vmatprep.mubr.msk.f32.mxu0 %vm289_vm0, %v275_v27  ;;  %1304 = vmatpush3.bf16.msra.mxu1 %v1301_v39 }
  0x52   : > { %1306 = vmatprep.subr.bf16.mxu1 %v1305_v42 }
  0x53   : > { %1328 = vmatpush3.bf16.msra.mxu0 %v1325_v57 }
  0x54   : > { %1156 = vmatmul.mubr.msk.f32.gmra.mrb[12].mxu0 %vm289_vm0, %v276_v28  ;;  %1330 = vmatprep.subr.bf16.mxu0 %v1329_v45 }
  0x55   : > { %1158 = vmatprep.mubr.msk.f32.mxu0 %vm289_vm0, %v277_v29  ;;  %1308 = vmatpush3.bf16.msra.mxu1 %v1305_v42 }
  0x57   : > { %1332 = vmatpush3.bf16.msra.mxu0 %v1329_v45  ;;  %v847_v45 = vld [vmem:[%s1775_s9] sm:$0xff] }
  0x58   : > { %1159 = vmatmul.mubr.msk.f32.gmra.mrb[14].mxu0 %vm289_vm0, %v278_v30  ;;  %1334 = vmatprep.subr.bf16.mxu0 %v1333_v48 }
  0x5b   : > { %1336 = vmatpush3.bf16.msra.mxu0 %v1333_v48 }
  0x5c   : > { %1338 = vmatprep.subr.bf16.mxu0 %v1337_v51 }
  0x5f   : > { %1340 = vmatpush3.bf16.msra.mxu0 %v1337_v51 }
 0x10f   : > { %v1139_v59 = vpop.f32.mrb[0].mxu0 }
 0x110   : > { %v410_v60 = vadd.f32 %v1139_v59, %v1728_v58  ;;  %v404_v61 = vpop.f32.mrb[1].mxu0 }
 0x111   : > { %v405_v62 = vadd.f32 %v1728_v58, %v404_v61 }
 0x113   : > { %1395 = vtanh.f32 %v405_v62  ;;  %v1142_v63 = vpop.f32.mrb[2].mxu0 }
 0x114   : > { %1397 = vtanh.f32 %v410_v60  ;;  %v420_v0 = vadd.f32 %v1142_v63, %v1728_v58  ;;  %v414_v1 = vpop.f32.mrb[3].mxu0 }
 0x115   : > { %v415_v2 = vadd.f32 %v1728_v58, %v414_v1 }
 0x117   : > { %1399 = vtanh.f32 %v415_v2  ;;  %v1145_v3 = vpop.f32.mrb[4].mxu0 }
 0x118   : > { %1401 = vtanh.f32 %v420_v0  ;;  %v430_v4 = vadd.f32 %v1145_v3, %v1728_v58  ;;  %v424_v5 = vpop.f32.mrb[5].mxu0 }
 0x119   : > { %v425_v6 = vadd.f32 %v1728_v58, %v424_v5 }
 0x11b   : > { %1403 = vtanh.f32 %v425_v6  ;;  %v1148_v7 = vpop.f32.mrb[6].mxu0 }
 0x11c   : > { %1405 = vtanh.f32 %v430_v4  ;;  %v440_v8 = vadd.f32 %v1148_v7, %v1728_v58  ;;  %v434_v9 = vpop.f32.mrb[7].mxu0 }
 0x11d   : > { %v1396_v10 = vpop.eup %1395  ;;  %v435_v11 = vadd.f32 %v1728_v58, %v434_v9 }
 0x11e   : > { %v1398_v12 = vpop.eup %1397  ;;  %1193 = vmatprep.mubr.f32.mxu1 %v1396_v10 }
 0x11f   : > { %1407 = vtanh.f32 %v435_v11  ;;  %v1151_v13 = vpop.f32.mrb[8].mxu0  ;;  %1194 = vmatmul.mubr.f32.vlgmr.msra.gmra.mrb[0].mxu1 %v1398_v12 }
 0x120   : > { %1409 = vtanh.f32 %v440_v8  ;;  %v450_v14 = vadd.f32 %v1151_v13, %v1728_v58  ;;  %v444_v15 = vpop.f32.mrb[9].mxu0 }
 0x121   : > { %v1400_v16 = vpop.eup %1399  ;;  %v445_v17 = vadd.f32 %v1728_v58, %v444_v15 }
 0x122   : > { %v1402_v18 = vpop.eup %1401  ;;  %1196 = vmatprep.mubr.f32.mxu1 %v1400_v16 }
 0x123   : > { %1411 = vtanh.f32 %v445_v17  ;;  %v1154_v19 = vpop.f32.mrb[10].mxu0  ;;  %1197 = vmatmul.mubr.f32.gmra.mrb[2].mxu1 %v1402_v18 }
 0x124   : > { %1413 = vtanh.f32 %v450_v14  ;;  %v460_v20 = vadd.f32 %v1154_v19, %v1728_v58  ;;  %v454_v21 = vpop.f32.mrb[11].mxu0 }
 0x125   : > { %v1404_v22 = vpop.eup %1403  ;;  %v455_v23 = vadd.f32 %v1728_v58, %v454_v21 }
 0x126   : > { %v1406_v24 = vpop.eup %1405  ;;  %1199 = vmatprep.mubr.f32.mxu1 %v1404_v22 }
 0x127   : > { %1415 = vtanh.f32 %v455_v23  ;;  %v1157_v25 = vpop.f32.mrb[12].mxu0  ;;  %1200 = vmatmul.mubr.f32.gmra.mrb[4].mxu1 %v1406_v24 }
 0x128   : > { %1417 = vtanh.f32 %v460_v20  ;;  %v470_v26 = vadd.f32 %v1157_v25, %v1728_v58  ;;  %v464_v27 = vpop.f32.mrb[13].mxu0 }
 0x129   : > { %v1408_v28 = vpop.eup %1407  ;;  %v465_v29 = vadd.f32 %v1728_v58, %v464_v27 }
 0x12a   : > { %v1410_v30 = vpop.eup %1409  ;;  %1202 = vmatprep.mubr.f32.mxu1 %v1408_v28 }
 0x12b   : > { %1419 = vtanh.f32 %v465_v29  ;;  %v1160_v31 = vpop.f32.mrb[14].mxu0  ;;  %1203 = vmatmul.mubr.f32.gmra.mrb[6].mxu1 %v1410_v30 }
 0x12c   : > { %1421 = vtanh.f32 %v470_v26  ;;  %v480_v32 = vadd.f32 %v1160_v31, %v1728_v58  ;;  %v474_v33 = vpop.f32.mrb[15].mxu0 }
 0x12d   : > { %v1412_v34 = vpop.eup %1411  ;;  %v475_v35 = vadd.f32 %v1728_v58, %v474_v33 }
 0x12e   : > { %v1414_v36 = vpop.eup %1413  ;;  %1205 = vmatprep.mubr.f32.mxu1 %v1412_v34 }
 0x12f   : > { %1423 = vtanh.f32 %v475_v35  ;;  %1206 = vmatmul.mubr.f32.gmra.mrb[8].mxu1 %v1414_v36 }
 0x130   : > { %1425 = vtanh.f32 %v480_v32 }
 0x131   : > { %v1416_v37 = vpop.eup %1415 }
 0x132   : > { %v1418_v38 = vpop.eup %1417  ;;  %1208 = vmatprep.mubr.f32.mxu1 %v1416_v37  ;;  %v282_v37 = vld [vmem:[%s1909_s4 + $0x3] sm:$0x1] }
 0x133   : > { %1209 = vmatmul.mubr.f32.gmra.mrb[10].mxu1 %v1418_v38  ;;  %v845_v38 = vmul.f32 1.442695, %v282_v37 }
 0x135   : > { %v1420_v39 = vpop.eup %1419 }
 0x136   : > { %v1422_v40 = vpop.eup %1421  ;;  %1211 = vmatprep.mubr.f32.mxu1 %v1420_v39  ;;  %v863_v39 = vlaneseq }
 0x137   : > { %1212 = vmatmul.mubr.f32.gmra.mrb[12].mxu1 %v1422_v40 }
 0x138   : > { %v864_v40 = vshrl.u32 %v863_v39, 7  ;;  %v859_v39 = vld [vmem:[%s1775_s9 + $0x60] sm:$0xff] }
 0x139   : > { %v1424_v41 = vpop.eup %1423 }
 0x13a   : > { %v1426_v42 = vpop.eup %1425  ;;  %1214 = vmatprep.mubr.f32.mxu1 %v1424_v41  ;;  %v865_v41 = vsub.s32 0, %v864_v40 }
 0x13b   : > { %1215 = vmatmul.mubr.f32.gmra.mrb[14].mxu1 %v1426_v42 }
 0x1f2   : > { %v1195_v53 = vpop.f32.mrb[0].mxu1 }
 0x1f3   : > { %v591_v54 = vadd.f32 %v1195_v53, %v1749_v52  ;;  %v585_v55 = vpop.f32.mrb[1].mxu1  ;;  %v849_v53 = vld [vmem:[%s1775_s9 + $0x10] sm:$0xff] }
 0x1f4   : > { %v586_v56 = vadd.f32 %v1749_v52, %v585_v55 }
 0x1f6   : > { %1427 = vtanh.f32 %v586_v56  ;;  %v1198_v57 = vpop.f32.mrb[2].mxu1 }
 0x1f7   : > { %1429 = vtanh.f32 %v591_v54  ;;  %v601_v58 = vadd.f32 %v1198_v57, %v1749_v52  ;;  %v595_v59 = vpop.f32.mrb[3].mxu1 }
 0x1f8   : > { %v596_v60 = vadd.f32 %v1749_v52, %v595_v59 }
 0x1fa   : > { %1431 = vtanh.f32 %v596_v60  ;;  %v1201_v61 = vpop.f32.mrb[4].mxu1  ;;  %v852_v60 = vld [vmem:[%s1775_s9 + $0x28] sm:$0xff] }
 0x1fb   : > { %1433 = vtanh.f32 %v601_v58  ;;  %v611_v62 = vadd.f32 %v1201_v61, %v1749_v52  ;;  %v605_v63 = vpop.f32.mrb[5].mxu1 }
 0x1fc   : > { %v606_v0 = vadd.f32 %v1749_v52, %v605_v63  ;;  %v851_v63 = vld [vmem:[%s1775_s9 + $0x20] sm:$0xff] }
 0x1fe   : > { %1435 = vtanh.f32 %v606_v0  ;;  %v1204_v1 = vpop.f32.mrb[6].mxu1 }
 0x1ff   : > { %1437 = vtanh.f32 %v611_v62  ;;  %v621_v2 = vadd.f32 %v1204_v1, %v1749_v52  ;;  %v615_v3 = vpop.f32.mrb[7].mxu1 }
 0x200   : > { %v1428_v4 = vpop.eup %1427  ;;  %v616_v5 = vadd.f32 %v1749_v52, %v615_v3 }
 0x201   : > { %v1430_v6 = vpop.eup %1429  ;;  %1249 = vmatprep.mubr.f32.mxu0 %v1428_v4 }
 0x202   : > { %1439 = vtanh.f32 %v616_v5  ;;  %v1207_v7 = vpop.f32.mrb[8].mxu1  ;;  %1250 = vmatmul.mubr.f32.vlgmr.msra.gmra.mrb[16].mxu0 %v1430_v6  ;;  %v854_v6 = vld [vmem:[%s1775_s9 + $0x38] sm:$0xff] }
 0x203   : > { %1441 = vtanh.f32 %v621_v2  ;;  %v631_v8 = vadd.f32 %v1207_v7, %v1749_v52  ;;  %v625_v9 = vpop.f32.mrb[9].mxu1 }
 0x204   : > { %v1432_v10 = vpop.eup %1431  ;;  %v626_v11 = vadd.f32 %v1749_v52, %v625_v9  ;;  %v853_v9 = vld [vmem:[%s1775_s9 + $0x30] sm:$0xff] }
 0x205   : > { %v1434_v12 = vpop.eup %1433  ;;  %1252 = vmatprep.mubr.f32.mxu0 %v1432_v10 }
 0x206   : > { %1443 = vtanh.f32 %v626_v11  ;;  %v1210_v13 = vpop.f32.mrb[10].mxu1  ;;  %1253 = vmatmul.mubr.f32.gmra.mrb[18].mxu0 %v1434_v12 }
 0x207   : > { %1445 = vtanh.f32 %v631_v8  ;;  %v641_v14 = vadd.f32 %v1210_v13, %v1749_v52  ;;  %v635_v15 = vpop.f32.mrb[11].mxu1 }
 0x208   : > { %v1436_v16 = vpop.eup %1435  ;;  %v636_v17 = vadd.f32 %v1749_v52, %v635_v15 }
 0x209   : > { %v1438_v18 = vpop.eup %1437  ;;  %1255 = vmatprep.mubr.f32.mxu0 %v1436_v16  ;;  %v856_v16 = vld [vmem:[%s1775_s9 + $0x48] sm:$0xff] }
 0x20a   : > { %1447 = vtanh.f32 %v636_v17  ;;  %v1213_v19 = vpop.f32.mrb[12].mxu1  ;;  %1256 = vmatmul.mubr.f32.gmra.mrb[20].mxu0 %v1438_v18 }
 0x20b   : > { %1449 = vtanh.f32 %v641_v14  ;;  %v651_v20 = vadd.f32 %v1213_v19, %v1749_v52  ;;  %v645_v21 = vpop.f32.mrb[13].mxu1  ;;  %v855_v19 = vld [vmem:[%s1775_s9 + $0x40] sm:$0xff] }
 0x20c   : > { %v1440_v22 = vpop.eup %1439  ;;  %v646_v23 = vadd.f32 %v1749_v52, %v645_v21 }
 0x20d   : > { %v1442_v24 = vpop.eup %1441  ;;  %1258 = vmatprep.mubr.f32.mxu0 %v1440_v22 }
 0x20e   : > { %1451 = vtanh.f32 %v646_v23  ;;  %v1216_v25 = vpop.f32.mrb[14].mxu1  ;;  %1259 = vmatmul.mubr.f32.gmra.mrb[22].mxu0 %v1442_v24 }
 0x20f   : > { %1453 = vtanh.f32 %v651_v20  ;;  %v661_v26 = vadd.f32 %v1216_v25, %v1749_v52  ;;  %v655_v27 = vpop.f32.mrb[15].mxu1 }
 0x210   : > { %v1444_v28 = vpop.eup %1443  ;;  %v656_v29 = vadd.f32 %v1749_v52, %v655_v27 }
 0x211   : > { %v1446_v30 = vpop.eup %1445  ;;  %1261 = vmatprep.mubr.f32.mxu0 %v1444_v28 }
 0x212   : > { %1455 = vtanh.f32 %v656_v29  ;;  %1262 = vmatmul.mubr.f32.gmra.mrb[24].mxu0 %v1446_v30  ;;  %v857_v29 = vld [vmem:[%s1775_s9 + $0x50] sm:$0xff] }
 0x213   : > { %1457 = vtanh.f32 %v661_v26  ;;  %v858_v26 = vld [vmem:[%s1775_s9 + $0x58] sm:$0xff] }
 0x214   : > { %v1448_v31 = vpop.eup %1447  ;;  %1459 = vpow2.f32 %v845_v38 }
 0x215   : > { %v1450_v32 = vpop.eup %1449  ;;  %1264 = vmatprep.mubr.f32.mxu0 %v1448_v31 }
 0x216   : > { %1265 = vmatmul.mubr.f32.gmra.mrb[26].mxu0 %v1450_v32 }
 0x218   : > { %v1452_v33 = vpop.eup %1451 }
 0x219   : > { %v1454_v34 = vpop.eup %1453  ;;  %1267 = vmatprep.mubr.f32.mxu0 %v1452_v33 }
 0x21a   : > { %1268 = vmatmul.mubr.f32.gmra.mrb[28].mxu0 %v1454_v34 }
 0x21c   : > { %v1456_v35 = vpop.eup %1455 }
 0x21d   : > { %v1458_v36 = vpop.eup %1457  ;;  %1270 = vmatprep.mubr.f32.mxu0 %v1456_v35 }
 0x21e   : > { %1271 = vmatmul.mubr.f32.gmra.mrb[30].mxu0 %v1458_v36  ;;  %v1460_v42 = vpop.eup %1459  ;;  %v860_v36 = vld [vmem:[%s1775_s9 + $0x68] sm:$0xff] }
 0x21f   : > { %v1777_v43 = vrot.slane %v1460_v42, %v865_v41 }
 0x221   : > { %v868_v47 = vmul.f32 %v1777_v43, %v848_v44  ;;  %v867_v49 = vmul.f32 %v1777_v43, %v847_v45  ;;  %v870_v56 = vmul.f32 %v1777_v43, %v850_v50  ;;  %v869_v59 = vmul.f32 %v1777_v43, %v849_v53 }
 0x222   : > { %v872_v2 = vmul.f32 %v1777_v43, %v852_v60  ;;  %v871_v5 = vmul.f32 %v1777_v43, %v851_v63  ;;  %v874_v12 = vmul.f32 %v1777_v43, %v854_v6  ;;  %v873_v15 = vmul.f32 %v1777_v43, %v853_v9 }
 0x223   : > { %v876_v22 = vmul.f32 %v1777_v43, %v856_v16  ;;  %v875_v25 = vmul.f32 %v1777_v43, %v855_v19  ;;  %v878_v32 = vmul.f32 %v1777_v43, %v858_v26  ;;  %v877_v35 = vmul.f32 %v1777_v43, %v857_v29 }
 0x224   : > { %v880_v42 = vmul.f32 %v1777_v43, %v860_v36 }
 0x2d5   : > { %v1251_v48 = vpop.f32.mrb[16].mxu0 }
 0x2d6   : > { %v772_v51 = vadd.f32 %v1251_v48, %v1785_v46  ;;  %v766_v52 = vpop.f32.mrb[17].mxu0  ;;  %v862_v48 = vld [vmem:[%s1775_s9 + $0x78] sm:$0xff] }
 0x2d7   : > { %v767_v54 = vadd.f32 %v1785_v46, %v766_v52 }
 0x2d8   : > { %v884_v55 = vadd.f32 %v868_v47, %v772_v51  ;;  %v879_v47 = vmul.f32 %v1777_v43, %v859_v39  ;;  %v861_v51 = vld [vmem:[%s1775_s9 + $0x70] sm:$0xff] }
 0x2d9   : > { %v883_v57 = vadd.f32 %v867_v49, %v767_v54  ;;  %v1254_v58 = vpop.f32.mrb[18].mxu0  ;;  %v882_v54 = vmul.f32 %v1777_v43, %v862_v48 }
 0x2da   : > { %900 = vst [vmem:[%s1798_s8 + $0x8] sm:$0xff] %v884_v55  ;;  %v782_v61 = vadd.f32 %v1254_v58, %v1785_v46  ;;  %v776_v62 = vpop.f32.mrb[19].mxu0 }
 0x2db   : > { %899 = vst [vmem:[%s1798_s8] sm:$0xff] %v883_v57  ;;  %v777_v0 = vadd.f32 %v1785_v46, %v776_v62  ;;  %v881_v57 = vmul.f32 %v1777_v43, %v861_v51 }
 0x2dc   : > { %v886_v1 = vadd.f32 %v870_v56, %v782_v61 }
 0x2dd   : > { %v885_v3 = vadd.f32 %v869_v59, %v777_v0  ;;  %v1257_v4 = vpop.f32.mrb[20].mxu0 }
 0x2de   : > { %902 = vst [vmem:[%s1798_s8 + $0x18] sm:$0xff] %v886_v1  ;;  %v792_v7 = vadd.f32 %v1257_v4, %v1785_v46  ;;  %v786_v8 = vpop.f32.mrb[21].mxu0 }
 0x2df   : > { %901 = vst [vmem:[%s1798_s8 + $0x10] sm:$0xff] %v885_v3  ;;  %v787_v10 = vadd.f32 %v1785_v46, %v786_v8 }
 0x2e0   : > { %v888_v11 = vadd.f32 %v872_v2, %v792_v7 }
 0x2e1   : > { %v887_v13 = vadd.f32 %v871_v5, %v787_v10  ;;  %v1260_v14 = vpop.f32.mrb[22].mxu0 }
 0x2e2   : > { %904 = vst [vmem:[%s1798_s8 + $0x28] sm:$0xff] %v888_v11  ;;  %v802_v17 = vadd.f32 %v1260_v14, %v1785_v46  ;;  %v796_v18 = vpop.f32.mrb[23].mxu0 }
 0x2e3   : > { %903 = vst [vmem:[%s1798_s8 + $0x20] sm:$0xff] %v887_v13  ;;  %v797_v20 = vadd.f32 %v1785_v46, %v796_v18 }
 0x2e4   : > { %v890_v21 = vadd.f32 %v874_v12, %v802_v17 }
 0x2e5   : > { %v889_v23 = vadd.f32 %v873_v15, %v797_v20  ;;  %v1263_v24 = vpop.f32.mrb[24].mxu0 }
 0x2e6   : > { %906 = vst [vmem:[%s1798_s8 + $0x38] sm:$0xff] %v890_v21  ;;  %v812_v27 = vadd.f32 %v1263_v24, %v1785_v46  ;;  %v806_v28 = vpop.f32.mrb[25].mxu0 }
 0x2e7   : > { %905 = vst [vmem:[%s1798_s8 + $0x30] sm:$0xff] %v889_v23  ;;  %v807_v30 = vadd.f32 %v1785_v46, %v806_v28 }
 0x2e8   : > { %v892_v31 = vadd.f32 %v876_v22, %v812_v27 }
 0x2e9   : > { %v891_v33 = vadd.f32 %v875_v25, %v807_v30  ;;  %v1266_v34 = vpop.f32.mrb[26].mxu0 }
 0x2ea   : > { %908 = vst [vmem:[%s1798_s8 + $0x48] sm:$0xff] %v892_v31  ;;  %v822_v37 = vadd.f32 %v1266_v34, %v1785_v46  ;;  %v816_v38 = vpop.f32.mrb[27].mxu0 }
 0x2eb   : > { %907 = vst [vmem:[%s1798_s8 + $0x40] sm:$0xff] %v891_v33  ;;  %v817_v40 = vadd.f32 %v1785_v46, %v816_v38 }
 0x2ec   : > { %v894_v41 = vadd.f32 %v878_v32, %v822_v37 }
 0x2ed   : > { %v893_v44 = vadd.f32 %v877_v35, %v817_v40  ;;  %v1269_v45 = vpop.f32.mrb[28].mxu0 }
 0x2ee   : > { %910 = vst [vmem:[%s1798_s8 + $0x58] sm:$0xff] %v894_v41  ;;  %v832_v49 = vadd.f32 %v1269_v45, %v1785_v46  ;;  %v826_v50 = vpop.f32.mrb[29].mxu0 }
 0x2ef   : > { %909 = vst [vmem:[%s1798_s8 + $0x50] sm:$0xff] %v893_v44  ;;  %v827_v52 = vadd.f32 %v1785_v46, %v826_v50 }
 0x2f0   : > { %v896_v53 = vadd.f32 %v880_v42, %v832_v49 }
 0x2f1   : > { %v895_v55 = vadd.f32 %v879_v47, %v827_v52  ;;  %v1272_v56 = vpop.f32.mrb[30].mxu0 }
 0x2f2   : > { %912 = vst [vmem:[%s1798_s8 + $0x68] sm:$0xff] %v896_v53  ;;  %v842_v58 = vadd.f32 %v1272_v56, %v1785_v46  ;;  %v836_v59 = vpop.f32.mrb[31].mxu0 }
 0x2f3   : > { %911 = vst [vmem:[%s1798_s8 + $0x60] sm:$0xff] %v895_v55  ;;  %v837_v60 = vadd.f32 %v1785_v46, %v836_v59 }
 0x2f4   : > { %v898_v61 = vadd.f32 %v882_v54, %v842_v58 }
 0x2f5   : > { %v897_v43 = vadd.f32 %v881_v57, %v837_v60 }
 0x2f6   : > { %914 = vst [vmem:[%s1798_s8 + $0x78] sm:$0xff] %v898_v61 }
 0x2f7   : > { %913 = vst [vmem:[%s1798_s8 + $0x70] sm:$0xff] %v897_v43 }
 0x2f8   : > { %1502 = shalt.err (!%p1499_p7)
}
 0x2f9   : > { %s1503_s7 = scalar_lea.hbm %s1856_s16, 2048  ;;  %s1507_s10 = scalar_lea.hbm %s1910_s5, 4096 }
 0x2fa   : > { %p1504_p8 = scmp.ne.s32.totalorder %s1856_s16, %s1503_s7  ;;  %p1508_p1 = scmp.lt.u32.totalorder %s1856_s16, %s1910_s5 }
 0x2fb   : > { %p1509_p0 = scmp.lt.u32.totalorder %s1507_s10, %s1503_s7  ;;  %p1511_p6 = scmp.lt.u32.totalorder %s1503_s7, %s1856_s16 }
 0x2fc   : > { %p1505_p11 = pnand %p1504_p8, %p1921_p9 }
 0x2fd   : > { %p1510_p5 = por %p1509_p0, %p1508_p1 }
 0x2fe   : > { %p1506_p13 = pneg %p1505_p11 }
 0x2ff   : > { %p1512_p10 = por %p1511_p6, %p1510_p5 }
 0x301   : > { %p1513_p12 = pnand %p1512_p10, %p1506_p13 }
 0x303   : > { %1516 = shalt.err (!%p1513_p12)
}
 0x304   : > { %s1561_s8 = smov 128   ;;  %s1562_s12 = smov 8  }
 0x305   : > { %1345 = dma.vmem_to_hbm [thread:$0]  (%p1921_p9), %s1858_s13, 2048, %s1856_s16, %s1864_s22, %s1561_s8, %s1561_s8, %s1562_s12  }
 0x306 PF: > { %p1357_p2 = scmp.ge.s32.totalorder %s1555_s21, 2  ;;  %s944_s14 = sand.u32 1, %s1543_s18  }
 0x307   : > { %p1922_p3 = scmp.ne.s32.totalorder %s1915_s29, 0  ;;  %s945_s15 = scalar_lea.sflag [#allocation4], %s944_s14 }
 0x309   : > { %p1352_p4 = pnand %p1357_p2, %p1922_p3 }
 0x30b   : > { %1538 = dma.done.wait (!%p1352_p4), %s945_s15, 2048  }
 0x30c   : > { %1540 = vsyncadd (!%p1352_p4), %s945_s15, 4294965248  ;;  %p16_p7 = scmp.ge.s32.totalorder %s1618_s24, 4   ;;  %s1923_s18 = smov %s1547_s19 }
 0x30d   : > { %s1924_s19 = smov %s1551_s20  ;;  %s1925_s20 = smov %s1629_s27 }
 0x30e   : > { %s1926_s21 = smov %s1618_s24  ;;  %18 = sbr.rel (!%p16_p7) target bundleno = 4 (0x4), region = 83 }
 0x315   :  { %950 = vsyncpa [#allocation3], 1 }
 0x316   :  { %952 = vsyncpa [#allocation3 + $0x1], 1 }
 0x317   :  { %953 = vsyncpa [#allocation4], 1 }
 0x318   :  { %955 = vsyncpa [#allocation4 + $0x1], 1 }

</bundles_post_ra>
